<compile_context>
chip_gen: v7x
topology: tpu7x:2x2x1
jax: 0.10.0
libtpu: 0.0.40
codegen_flags: <defaults>
</compile_context>

<pallas_src>
import functools

import jax
import jax.numpy as jnp
from jax.experimental import pallas as pl
from jax.experimental.pallas import tpu as pltpu

_LANE = 128
_SUBLANE = 8


def _round_up(n, m):
    return ((n + m - 1) // m) * m


def _round_down(n, m):
    return (n // m) * m


def _num_tensorcores():
    """Best-effort detection of TensorCores per chip (v7x exposes 2)."""
    try:
        kind = jax.devices()[0].device_kind.lower()
    except Exception:
        return 1
    return 2 if "v7" in kind else 1


def _head_kernel(*refs, n_layers: int):
    """Fused MLP head: refs = (x, w1, b1, ..., wn, bn, out).

    Weights are (in, out) (hidden widths lane-padded with exact zeros);
    biases are (1, out) f32.  Matmuls hit the MXU with f32 accumulation, the
    bias-add + ReLU epilogue runs in f32 on the VPU.  Intermediate
    activations live entirely in values (vregs) — only the final (M, out_dim)
    result is stored.
    """
    x_ref = refs[0]
    o_ref = refs[-1]
    h = x_ref[...]
    for i in range(n_layers):
        w = refs[1 + 2 * i][...]
        b = refs[2 + 2 * i][...]          # f32 (1, out)
        h = jnp.dot(h.astype(w.dtype), w, preferred_element_type=jnp.float32) + b
        if i < n_layers - 1:
            h = jnp.maximum(h, 0.0)
    o_ref[...] = h.astype(o_ref.dtype)


def init_head_params(key, dims):
    """Deterministic init matching nn.Linear shapes: weight (out, in), bias (out,)."""
    params = []
    for i in range(len(dims) - 1):
        key, kw, kb = jax.random.split(key, 3)
        fan_in = dims[i]
        bound = 1.0 / jnp.sqrt(jnp.float32(fan_in))
        w = jax.random.uniform(kw, (dims[i + 1], dims[i]), jnp.float32, -bound, bound)
        b = jax.random.uniform(kb, (dims[i + 1],), jnp.float32, -bound, bound)
        params.append((w, b))
    return params


def prep_head_params(params, lane=_LANE, pad_hidden=True, param_dtype=jnp.float32):
    """One-time (outside the hot path) conversion to kernel layout.

    [(w (out,in), b (out,)), ...]  ->  flat [w1_t (in,out), b1 (1,out), ...]
    Hidden output widths are zero-padded to multiples of `lane` (exact; zeros
    propagate through ReLU and meet zero rows of the next weight).  The FINAL
    layer's output width is left untouched so the kernel stores exactly
    out_dim columns — no pad-then-slice HBM round-trip.
    Set param_dtype=jnp.bfloat16 on v6e/v7x to halve weight/input DMA bytes
    (accumulation stays f32; biases stay f32).
    Returns (flat_params, true_out_dim).
    """
    n = len(params)
    out_dim = int(params[-1][0].shape[0])
    flat = []
    prev_pad = 0  # zero-rows to prepend-match previous layer's padded width
    for i, (w, b) in enumerate(params):
        w_t = jnp.asarray(w, jnp.float32).T            # (in, out)
        b2 = jnp.asarray(b, jnp.float32).reshape(1, -1)  # (1, out), kept f32
        if prev_pad:
            w_t = jnp.pad(w_t, ((0, prev_pad), (0, 0)))
        if pad_hidden and i < n - 1:
            n_out = w_t.shape[1]
            n_tgt = _round_up(n_out, lane)
            if n_tgt != n_out:
                w_t = jnp.pad(w_t, ((0, 0), (0, n_tgt - n_out)))
                b2 = jnp.pad(b2, ((0, 0), (0, n_tgt - n_out)))
            prev_pad = n_tgt - n_out
        else:
            prev_pad = 0
        flat.extend([w_t.astype(param_dtype), b2])
    return flat, out_dim


def head_forward(flat_params, out_dim, x, *, tile_m=None, use_grid=None):
    """Pallas-backed fused forward pass of `Head`.

    Single pallas_call per forward.
      - Small / single-TC batches: whole-array VMEM-resident program (one
        prologue DMA, no pipelining of zero-reuse operands).
      - Large batches: M is tiled with a pl.cdiv grid marked "parallel" so
        v7x shards rows across its two TensorCores; tile_m defaults to
        512-1024 to amortize the ~0.35 us/step grid overhead.
    """
    n_layers = len(flat_params) // 2
    M, K = x.shape
    n_cores = _num_tensorcores()

    # --- per-generation path selection --------------------------------------
    if use_grid is None:
        if n_cores >= 2:
            # v7x: a grid only pays off once there are >= 2 decent-size steps
            # to shard across the two TensorCores.
            use_grid = M >= 1024
        else:
            # v5e/v6e: single TC -> the grid is just a serial loop; stay on the
            # whole-array resident path while the activation footprint is tiny
            # (~(K + out_dim)*4 B per row << scoped VMEM limit).
            use_grid = M > 16384

    # --- advisory cost estimate so XLA schedules around this tiny kernel ----
    flops = 2 * M * sum(
        int(flat_params[2 * i].shape[0]) * int(flat_params[2 * i].shape[1])
        for i in range(n_layers)
    )
    param_bytes = sum(int(p.size) * p.dtype.itemsize for p in flat_params)
    bytes_accessed = int(M * K * x.dtype.itemsize
                         + M * out_dim * x.dtype.itemsize
                         + param_bytes)
    cost = pl.CostEstimate(flops=flops, transcendentals=0,
                           bytes_accessed=bytes_accessed)

    kernel = functools.partial(_head_kernel, n_layers=n_layers)

    if use_grid:
        if tile_m is None:
            if n_cores >= 2:
                # keep >= 2 grid steps (balanced across the 2 TCs), cap at 1024
                tile_m = min(1024, max(_SUBLANE, _round_down(M // 2, _SUBLANE)))
            else:
                tile_m = 1024
        tile_m = max(_SUBLANE, min(_round_up(tile_m, _SUBLANE), _round_up(M, _SUBLANE)))
        grid_m = pl.cdiv(M, tile_m)

        # x / out are streamed over M; the (tiny, grid-invariant) weights and
        # biases map to the same block every step, so Pallas fetches them once.
        in_specs = [pl.BlockSpec((tile_m, K), lambda i: (i, 0))]
        for p in flat_params:
            in_specs.append(pl.BlockSpec(p.shape, lambda i: (0, 0)))

        out = pl.pallas_call(
            kernel,
            out_shape=jax.ShapeDtypeStruct((M, out_dim), x.dtype),
            grid=(grid_m,),
            in_specs=in_specs,
            out_specs=pl.BlockSpec((tile_m, out_dim), lambda i: (i, 0)),
            compiler_params=pltpu.CompilerParams(
                dimension_semantics=("parallel",)),
            cost_estimate=cost,
        )(x, *flat_params)
    else:
        # Resident path: whole arrays in VMEM, one prologue DMA, no pipelining
        # of zero-reuse operands.
        vmem = pl.BlockSpec(memory_space=pltpu.MemorySpace.VMEM)
        out = pl.pallas_call(
            kernel,
            out_shape=jax.ShapeDtypeStruct((M, out_dim), x.dtype),
            in_specs=[vmem] * (1 + len(flat_params)),
            out_specs=vmem,
            cost_estimate=cost,
        )(x, *flat_params)

    return out


def head_forward_ref(params, x):
    """Pure-JAX reference for correctness checking (original PyTorch layout)."""
    n_layers = len(params)
    h = x
    for i, (w, b) in enumerate(params):
        h = h @ w.T + b
        if i < n_layers - 1:
            h = jnp.maximum(h, 0.0)
    return h


if __name__ == "__main__":
    # Head(dims) with dims = [32, 64, 48, 16]: two hidden Linear+ReLU, one final Linear.
    dims = [32, 64, 48, 16]
    batch = 2

    key = jax.random.PRNGKey(0)
    key, kx = jax.random.split(key)
    x = jax.random.normal(kx, (batch, dims[0]), jnp.float32)

    params = init_head_params(key, dims)
    flat_params, out_dim = prep_head_params(params)   # one-time layout prep

    # 1) Small batch — whole-array VMEM-resident path (matches module usage).
    out = jax.block_until_ready(head_forward(flat_params, out_dim, x))
    ref = head_forward_ref(params, x)
    assert out.shape == (batch, dims[-1])
    assert jnp.allclose(out, ref, atol=1e-4, rtol=1e-4), "mismatch (batch=2)"

    # 2) Large batch — default per-platform path selection (tiled+parallel on
    #    v7x, resident on single-TC v5e/v6e).
    xb = jax.random.normal(jax.random.PRNGKey(1), (4096, dims[0]), jnp.float32)
    outb = jax.block_until_ready(head_forward(flat_params, out_dim, xb))
    refb = head_forward_ref(params, xb)
    assert outb.shape == (4096, dims[-1])
    assert jnp.allclose(outb, refb, atol=1e-4, rtol=1e-4), "mismatch (batch=4096)"

    # 3) Force the tiled pl.cdiv grid with a ragged M (partial last tile) to
    #    exercise the row-masked store path on every generation.
    xc = jax.random.normal(jax.random.PRNGKey(2), (1537, dims[0]), jnp.float32)
    outc = jax.block_until_ready(
        head_forward(flat_params, out_dim, xc, tile_m=512, use_grid=True))
    refc = head_forward_ref(params, xc)
    assert outc.shape == (1537, dims[-1])
    assert jnp.allclose(outc, refc, atol=1e-4, rtol=1e-4), "mismatch (batch=1537)"

    print("KERNEL_OK")
</pallas_src>

<mosaic_0001>
module attributes {stable_mosaic.version = 11 : i64} {
  func.func @_head_kernel(%arg0: memref<2x32xf32, #tpu.memory_space<vmem>>, %arg1: memref<32x128xf32, #tpu.memory_space<vmem>>, %arg2: memref<1x128xf32, #tpu.memory_space<vmem>>, %arg3: memref<128x128xf32, #tpu.memory_space<vmem>>, %arg4: memref<1x128xf32, #tpu.memory_space<vmem>>, %arg5: memref<128x16xf32, #tpu.memory_space<vmem>>, %arg6: memref<1x16xf32, #tpu.memory_space<vmem>>, %arg7: memref<2x16xf32, #tpu.memory_space<vmem>>) attributes {dimension_semantics = [], scalar_prefetch = 0 : i64, scratch_operands = 0 : i64, tpu.core_type = #tpu.core_type<tc>} {
    %c0 = arith.constant 0 : index
    %c0_0 = arith.constant 0 : index
    %0 = vector.load %arg0[%c0, %c0_0] : memref<2x32xf32, #tpu.memory_space<vmem>>, vector<2x32xf32>
    %c0_1 = arith.constant 0 : index
    %c0_2 = arith.constant 0 : index
    %1 = vector.load %arg1[%c0_1, %c0_2] : memref<32x128xf32, #tpu.memory_space<vmem>>, vector<32x128xf32>
    %c0_3 = arith.constant 0 : index
    %c0_4 = arith.constant 0 : index
    %2 = vector.load %arg2[%c0_3, %c0_4] : memref<1x128xf32, #tpu.memory_space<vmem>>, vector<1x128xf32>
    %cst = arith.constant dense<0.000000e+00> : vector<2x128xf32>
    %3 = tpu.matmul %0, %1, %cst {dimension_numbers = #tpu.dot_dimension_numbers<[1], [0], [0], [1], [0, 0, 1, 1], [], []>} : vector<2x32xf32>, vector<32x128xf32>, vector<2x128xf32> -> vector<2x128xf32>
    %4 = vector.broadcast %2 : vector<1x128xf32> to vector<2x128xf32>
    %5 = arith.addf %3, %4 : vector<2x128xf32>
    %cst_5 = arith.constant 0.000000e+00 : f32
    %6 = vector.broadcast %cst_5 : f32 to vector<2x128xf32>
    %7 = arith.maximumf %5, %6 : vector<2x128xf32>
    %c0_6 = arith.constant 0 : index
    %c0_7 = arith.constant 0 : index
    %8 = vector.load %arg3[%c0_6, %c0_7] : memref<128x128xf32, #tpu.memory_space<vmem>>, vector<128x128xf32>
    %c0_8 = arith.constant 0 : index
    %c0_9 = arith.constant 0 : index
    %9 = vector.load %arg4[%c0_8, %c0_9] : memref<1x128xf32, #tpu.memory_space<vmem>>, vector<1x128xf32>
    %cst_10 = arith.constant dense<0.000000e+00> : vector<2x128xf32>
    %10 = tpu.matmul %7, %8, %cst_10 {dimension_numbers = #tpu.dot_dimension_numbers<[1], [0], [0], [1], [0, 0, 1, 1], [], []>} : vector<2x128xf32>, vector<128x128xf32>, vector<2x128xf32> -> vector<2x128xf32>
    %11 = vector.broadcast %9 : vector<1x128xf32> to vector<2x128xf32>
    %12 = arith.addf %10, %11 : vector<2x128xf32>
    %cst_11 = arith.constant 0.000000e+00 : f32
    %13 = vector.broadcast %cst_11 : f32 to vector<2x128xf32>
    %14 = arith.maximumf %12, %13 : vector<2x128xf32>
    %c0_12 = arith.constant 0 : index
    %c0_13 = arith.constant 0 : index
    %15 = vector.load %arg5[%c0_12, %c0_13] : memref<128x16xf32, #tpu.memory_space<vmem>>, vector<128x16xf32>
    %c0_14 = arith.constant 0 : index
    %c0_15 = arith.constant 0 : index
    %16 = vector.load %arg6[%c0_14, %c0_15] : memref<1x16xf32, #tpu.memory_space<vmem>>, vector<1x16xf32>
    %cst_16 = arith.constant dense<0.000000e+00> : vector<2x16xf32>
    %17 = tpu.matmul %14, %15, %cst_16 {dimension_numbers = #tpu.dot_dimension_numbers<[1], [0], [0], [1], [0, 0, 1, 1], [], []>} : vector<2x128xf32>, vector<128x16xf32>, vector<2x16xf32> -> vector<2x16xf32>
    %18 = vector.broadcast %16 : vector<1x16xf32> to vector<2x16xf32>
    %19 = arith.addf %17, %18 : vector<2x16xf32>
    %c0_17 = arith.constant 0 : index
    %c0_18 = arith.constant 0 : index
    %20 = vector.load %arg7[%c0_17, %c0_18] : memref<2x16xf32, #tpu.memory_space<vmem>>, vector<2x16xf32>
    tpu.vector_store %arg7[%c0_17, %c0_18], %19 {strides = array<i32>} : memref<2x16xf32, #tpu.memory_space<vmem>>, vector<2x16xf32>,
    return
  }
}

</mosaic_0001>

<bundles_post_ra>
// kernel: tpu_custom_call.1
= control target key start
LH: loop header
LB: loop body
LE: loop exit
PB: predicated region body
PF: predicated region fallthrough
CT: control target
= control target key end

     0   :  { %12 = vsyncpa [#allocation3], 0  ;;  %s765_s0 = inlined_call_operand.vmem [shape: f32[2,32], index: 0, kind: input, shape index: {}]   ;;  %s766_s1 = inlined_call_operand.hbm [shape: f32[32,128], index: 1, kind: input, shape index: {}]   ;;  %s767_s2 = inlined_call_operand.vmem [shape: f32[1,128], index: 2, kind: input, shape index: {}]   ;;  %s768_s3 = inlined_call_operand.vmem [shape: f32[128,128], index: 3, kind: input, shape index: {}]   ;;  %s769_s4 = inlined_call_operand.vmem [shape: f32[1,128], index: 4, kind: input, shape index: {}]   ;;  %s770_s5 = inlined_call_operand.vmem [shape: f32[128,16], index: 5, kind: input, shape index: {}]   ;;  %s771_s6 = inlined_call_operand.vmem [shape: f32[1,16], index: 6, kind: input, shape index: {}]   ;;  %s772_s7 = inlined_call_operand.hbm [shape: f32[2,16], index: 7, kind: output, shape index: {}]  }
   0x1   :  { %13 = vsyncpa [#allocation4], 0  ;;  %s565_s24 = smov [#allocation2]   ;;  %s517_s28 = scalar_lea.hbm %s766_s1, 512 }
   0x2   :  { %s21_s25 = sshll.u32 %s565_s24, 4  ;;  %p518_p0 = scmp.ne.s32.totalorder %s766_s1, %s517_s28  ;;  %s22_s25 = int_to_ptr.vmem [resolvable:$true] %s21_s25 }
   0x3   :  { %p521_p1 = scmp.lt.u32.totalorder %s517_s28, %s766_s1 }
   0x5   :  { %p523_p2 = pnand %p521_p1, %p518_p0 }
   0x7   :  { %526 = shalt.err (!%p523_p2)
}
   0x8   :  { %s527_s10 = scalar_lea.vmem %s22_s25, 512  ;;  %p532_p4 = scmp.lt.s32.totalorder %s22_s25, %s22_s25 }
   0x9   :  { %p528_p3 = scmp.ne.s32.totalorder %s22_s25, %s527_s10  ;;  %p533_p5 = scmp.lt.s32.totalorder %s527_s10, %s527_s10 }
   0xb   :  { %p534_p6 = por %p533_p5, %p532_p4 }
   0xd   :  { %p535_p7 = pnand %p534_p6, %p528_p3 }
   0xf   :  { %538 = shalt.err (!%p535_p7)
}
  0x10   :  { %s566_s11 = smov 128   ;;  %s567_s12 = smov 8  }
  0x11   :  { %27 = dma.hbm_to_vmem [thread:$0]  %s766_s1, 512, %s22_s25, [#allocation3], %s566_s11, %s566_s11, %s567_s12  }
  0x12   :  { %561 = dma.done.wait [#allocation3], 512  }
  0x13   :  { %562 = vsyncadd [#allocation3], 4294966784  ;;  %v568_v0 = vmov 0.0|0.0   ;;  %vm569_vm0 = vmmov 0   ;;  %v570_v1 = vmov 0.0   ;;  %v42_v2 = vld [vmem:[#allocation2] sm:$0xff] }
  0x14   :  { %456 = vmatprep.subr.bf16.mxu0 %v568_v0  ;;  %383 = vmatprep.mubr.msk.f32.mxu0 %vm569_vm0, %v570_v1  ;;  %v43_v3 = vld [vmem:[#allocation2 + $0x8] sm:$0xff]  ;;  %v44_v4 = vld [vmem:[#allocation2 + $0x10] sm:$0xff]  ;;  %v45_v6 = vld [vmem:[#allocation2 + $0x18] sm:$0xff]  ;;  %vm53_vm1 = vcmask 261120   ;;  %s571_s9 = smov [#allocation5]   ;;  %vm315_vm2 = vcmask 123904  }
  0x15   :  { %462 = vmatprep.subr.bf16.mxu1 %v568_v0  ;;  %418 = vmatprep.mubr.msk.f32.mxu1 %vm569_vm0, %v570_v1  ;;  %v457_v5 = vpack.c.bf16 %v43_v3, %v42_v2  ;;  %v128_v7 = vld [vmem:[%s768_s3] sm:$0xff]  ;;  %v129_v8 = vld [vmem:[%s768_s3 + $0x8] sm:$0xff]  ;;  %v130_v9 = vld [vmem:[%s768_s3 + $0x10] sm:$0xff]  ;;  %v460_v11 = vpack.c.bf16 %v45_v6, %v44_v4  ;;  %s323_s10 = sshll.u32 %s571_s9, 4  ;;  %s324_s10 = int_to_ptr.vmem [resolvable:$true] %s323_s10 }
  0x16   :  { %v131_v10 = vld [vmem:[%s768_s3 + $0x18] sm:$0xff]  ;;  %v463_v12 = vpack.c.bf16 %v129_v8, %v128_v7  ;;  %v132_v14 = vld [vmem:[%s768_s3 + $0x20] sm:$0xff]  ;;  %v133_v15 = vld [vmem:[%s768_s3 + $0x28] sm:$0xff]  ;;  %p544_p9 = scmp.lt.s32.totalorder %s324_s10, %s324_s10 }
  0x17   :  { %458 = vmatpush3.bf16.msra.mxu0 %v457_v5  ;;  %v466_v13 = vpack.c.bf16 %v131_v10, %v130_v9  ;;  %v41_v16 = vld [vmem:[%s765_s0] sm:$0x3]  ;;  %v469_v17 = vpack.c.bf16 %v133_v15, %v132_v14  ;;  %v134_v18 = vld [vmem:[%s768_s3 + $0x30] sm:$0xff]  ;;  %v135_v19 = vld [vmem:[%s768_s3 + $0x38] sm:$0xff] }
  0x18   :  { %459 = vmatprep.subr.bf16.mxu0 %v568_v0  ;;  %464 = vmatpush3.bf16.msra.mxu1 %v463_v12  ;;  %v472_v20 = vpack.c.bf16 %v135_v19, %v134_v18  ;;  %v136_v21 = vld [vmem:[%s768_s3 + $0x40] sm:$0xff]  ;;  %v137_v22 = vld [vmem:[%s768_s3 + $0x48] sm:$0xff]  ;;  %v138_v24 = vld [vmem:[%s768_s3 + $0x50] sm:$0xff] }
  0x19   :  { %465 = vmatprep.subr.bf16.mxu1 %v568_v0  ;;  %v475_v23 = vpack.c.bf16 %v137_v22, %v136_v21  ;;  %v139_v25 = vld [vmem:[%s768_s3 + $0x58] sm:$0xff]  ;;  %v140_v27 = vld [vmem:[%s768_s3 + $0x60] sm:$0xff]  ;;  %v141_v28 = vld [vmem:[%s768_s3 + $0x68] sm:$0xff] }
  0x1a   :  { %v478_v26 = vpack.c.bf16 %v139_v25, %v138_v24  ;;  %v481_v29 = vpack.c.bf16 %v141_v28, %v140_v27  ;;  %v142_v30 = vld [vmem:[%s768_s3 + $0x70] sm:$0xff]  ;;  %v143_v31 = vld [vmem:[%s768_s3 + $0x78] sm:$0xff]  ;;  %v222_v33 = vld [vmem:[%s770_s5] sm:$0xff] }
  0x1b   :  { %461 = vmatpush3.bf16.msra.mxu0 %v460_v11  ;;  %v484_v32 = vpack.c.bf16 %v143_v31, %v142_v30  ;;  %v223_v34 = vld [vmem:[%s770_s5 + $0x8] sm:$0xff]  ;;  %v224_v35 = vld [vmem:[%s770_s5 + $0x10] sm:$0xff]  ;;  %v225_v37 = vld [vmem:[%s770_s5 + $0x18] sm:$0xff] }
  0x1c   :  { %486 = vmatprep.subr.bf16.mxu0 %v568_v0  ;;  %467 = vmatpush3.bf16.msra.mxu1 %v466_v13  ;;  %v487_v36 = vpack.c.bf16 %v223_v34, %v222_v33  ;;  %v490_v38 = vpack.c.bf16 %v225_v37, %v224_v35  ;;  %v226_v39 = vld [vmem:[%s770_s5 + $0x20] sm:$0xff]  ;;  %v227_v40 = vld [vmem:[%s770_s5 + $0x28] sm:$0xff]  ;;  %v228_v42 = vld [vmem:[%s770_s5 + $0x30] sm:$0xff] }
  0x1d   :  { %468 = vmatprep.subr.bf16.mxu1 %v568_v0  ;;  %v493_v41 = vpack.c.bf16 %v227_v40, %v226_v39  ;;  %v229_v43 = vld [vmem:[%s770_s5 + $0x38] sm:$0xff]  ;;  %v230_v45 = vld [vmem:[%s770_s5 + $0x40] sm:$0xff]  ;;  %v231_v46 = vld [vmem:[%s770_s5 + $0x48] sm:$0xff] }
  0x1e   :  { %384 = vmatmul.mubr.msk.f32.vlgmr.msra.gmra.mrb[0].mxu0 %vm53_vm1, %v41_v16  ;;  %v496_v44 = vpack.c.bf16 %v229_v43, %v228_v42  ;;  %v499_v47 = vpack.c.bf16 %v231_v46, %v230_v45  ;;  %v232_v48 = vld [vmem:[%s770_s5 + $0x50] sm:$0xff]  ;;  %v233_v49 = vld [vmem:[%s770_s5 + $0x58] sm:$0xff]  ;;  %v234_v51 = vld [vmem:[%s770_s5 + $0x60] sm:$0xff] }
  0x1f   :  { %453 = vmatprep.mubr.msk.f32.mxu0 %vm569_vm0, %v570_v1  ;;  %488 = vmatpush3.bf16.msra.mxu0 %v487_v36  ;;  %v502_v50 = vpack.c.bf16 %v233_v49, %v232_v48  ;;  %v235_v52 = vld [vmem:[%s770_s5 + $0x68] sm:$0xff]  ;;  %v332_v54 = vld [vmem:[%s767_s2] ss:$0 sm:$0xff]  ;;  %v236_v59 = vld [vmem:[%s770_s5 + $0x70] sm:$0xff] }
  0x20   :  { %470 = vmatpush3.bf16.msra.mxu1 %v469_v17  ;;  %489 = vmatprep.subr.bf16.mxu0 %v568_v0  ;;  %v505_v53 = vpack.c.bf16 %v235_v52, %v234_v51  ;;  %v237_v60 = vld [vmem:[%s770_s5 + $0x78] sm:$0xff]  ;;  %v334_v62 = vld [vmem:[%s769_s4] ss:$0 sm:$0xff]  ;;  %s539_s5 = scalar_lea.vmem %s324_s10, 32 }
  0x21   :  { %471 = vmatprep.subr.bf16.mxu1 %v568_v0  ;;  %v508_v61 = vpack.c.bf16 %v237_v60, %v236_v59  ;;  %v335_v3 = vld [vmem:[%s771_s6] ss:$0 sm:$0xff]  ;;  %p540_p8 = scmp.ne.s32.totalorder %s324_s10, %s539_s5  ;;  %p545_p10 = scmp.lt.s32.totalorder %s539_s5, %s539_s5 }
  0x23   :  { %491 = vmatpush3.bf16.msra.mxu0 %v490_v38  ;;  %p546_p11 = por %p545_p10, %p544_p9 }
  0x24   :  { %473 = vmatpush3.bf16.msra.mxu1 %v472_v20  ;;  %492 = vmatprep.subr.bf16.mxu0 %v568_v0 }
  0x25   :  { %474 = vmatprep.subr.bf16.mxu1 %v568_v0  ;;  %p547_p12 = pnand %p546_p11, %p540_p8 }
  0x27   :  { %494 = vmatpush3.bf16.msra.mxu0 %v493_v41 }
  0x28   :  { %476 = vmatpush3.bf16.msra.mxu1 %v475_v23  ;;  %495 = vmatprep.subr.bf16.mxu0 %v568_v0 }
  0x29   :  { %477 = vmatprep.subr.bf16.mxu1 %v568_v0 }
  0x2b   :  { %497 = vmatpush3.bf16.msra.mxu0 %v496_v44 }
  0x2c   :  { %479 = vmatpush3.bf16.msra.mxu1 %v478_v26  ;;  %498 = vmatprep.subr.bf16.mxu0 %v568_v0 }
  0x2d   :  { %480 = vmatprep.subr.bf16.mxu1 %v568_v0 }
  0x2f   :  { %500 = vmatpush3.bf16.msra.mxu0 %v499_v47 }
  0x30   :  { %482 = vmatpush3.bf16.msra.mxu1 %v481_v29  ;;  %501 = vmatprep.subr.bf16.mxu0 %v568_v0 }
  0x31   :  { %483 = vmatprep.subr.bf16.mxu1 %v568_v0 }
  0x33   :  { %503 = vmatpush3.bf16.msra.mxu0 %v502_v50 }
  0x34   :  { %485 = vmatpush3.bf16.msra.mxu1 %v484_v32  ;;  %504 = vmatprep.subr.bf16.mxu0 %v568_v0 }
  0x37   :  { %506 = vmatpush3.bf16.msra.mxu0 %v505_v53 }
  0x38   :  { %507 = vmatprep.subr.bf16.mxu0 %v568_v0 }
  0x3b   :  { %509 = vmatpush3.bf16.msra.mxu0 %v508_v61 }
  0xf1   :  { %v123_v55 = vpop.f32.mrb[0].mxu0 }
  0xf2   :  { %v124_v56 = vadd.f32 %v332_v54, %v123_v55  ;;  %v385_v57 = vpop.f32.mrb[1].mxu0 }
  0xf4   :  { %v127_v58 = vmax.f32 %v124_v56, 0.0 }
  0xf6   :  { %419 = vmatmul.mubr.f32.vlgmr.msra.gmra.mrb[0].mxu1 %v127_v58 }
 0x1c9   :  { %v217_v63 = vpop.f32.mrb[0].mxu1 }
 0x1ca   :  { %v218_v0 = vadd.f32 %v334_v62, %v217_v63  ;;  %v420_v1 = vpop.f32.mrb[1].mxu1 }
 0x1cc   :  { %v221_v2 = vmax.f32 %v218_v0, 0.0 }
 0x1ce   :  { %454 = vmatmul.mubr.f32.vlgmr.msra.gmra.mrb[2].mxu0 %v221_v2 }
 0x2a1   :  { %v311_v4 = vpop.f32.mrb[2].mxu0 }
 0x2a2   :  { %v312_v5 = vadd.f32 %v335_v3, %v311_v4  ;;  %v455_v6 = vpop.f32.mrb[3].mxu0 }
 0x2a4   :  { %316 = vst.msk [vmem:[#allocation5] sm:$0x3] %vm315_vm2, %v312_v5 }
 0x2a5   :  { %550 = shalt.err (!%p547_p12)
}
 0x2a6   :  { %s551_s12 = scalar_lea.hbm %s772_s7, 32 }
 0x2a7   :  { %p552_p13 = scmp.ne.s32.totalorder %s772_s7, %s551_s12  ;;  %p555_p0 = scmp.lt.u32.totalorder %s551_s12, %s772_s7 }
 0x2a9   :  { %p557_p1 = pnand %p555_p0, %p552_p13 }
 0x2ab   :  { %560 = shalt.err (!%p557_p1)
}
 0x2ac   :  { %326 = dma.vmem_to_hbm [thread:$0]  %s324_s10, 32, %s772_s7, [#allocation4]  }
 0x2ad   :  { %563 = dma.done.wait [#allocation4], 32  }
 0x2ae   :  { %564 = vsyncadd [#allocation4], 4294967264 }
 0x2af   :  { %330 = vsyncpa [#allocation3], 1 }
 0x2b0   :  { %331 = vsyncpa [#allocation4], 1 }

</bundles_post_ra>
